<compile_context>
chip_gen: v7x
topology: tpu7x:2x2x1
jax: 0.10.0
libtpu: 0.0.40
codegen_flags: <defaults>
</compile_context>

<pallas_src>
import functools

import jax
import jax.numpy as jnp
import numpy as np
from jax.experimental import pallas as pl
from jax.experimental.pallas import tpu as pltpu


def _round_up(x, m):
    return ((x + m - 1) // m) * m


def _tpu_budget():
    """Generation-aware tiling budget.

    Returns (dual_tensorcore, points_per_step, vmem_cap_bytes).
    Working set is ~76 B/point per buffer set (12 B in + 64 B out),
    ~152 B/point once double-buffered.
    """
    kind = ""
    try:
        kind = jax.devices()[0].device_kind.lower()
    except Exception:
        pass
    vmem_cap = None
    try:
        vmem_cap = int(pltpu.get_tpu_info().vmem_capacity_bytes)
    except Exception:
        pass
    is_v7 = ("v7" in kind) or ("7x" in kind) or (
        vmem_cap is not None and vmem_cap <= (64 << 20))
    if is_v7:
        # v7x: 64 MiB VMEM per TC, 2 TCs -> ~128K pts/step (~20 MiB dbl-buf).
        return True, 128 * 1024, 48 << 20
    # v5e / v6e: 128 MiB VMEM, single TC -> ~256K pts/step (~39 MiB dbl-buf).
    return False, 256 * 1024, 100 << 20


# ----------------------------------------------------------------------------
# Pallas kernel: one grid step handles a (bh_tile, 3, n_tile) slab of points.
# ----------------------------------------------------------------------------
def _diff_positions_kernel(keys_ref, lc_ref, fi_ref, *, ts, eps):
    """keys_ref: (BH, 3, N) f32 block.  lc_ref: (BH, 8, N) f32, fi_ref: (BH, 8, N) i32."""
    ts0, ts1, ts2 = ts
    bh_t, _, n_t = keys_ref.shape
    out_shape = (bh_t, 8, n_t)

    k = keys_ref[...]                                   # (BH, 3, N)
    k = jnp.clip(k, -1.0 + eps, 1.0 - eps)

    # GradientBalancing.forward is a plain multiply by (tensor_size - 1) * 0.5.
    s0 = (ts0 - 1) * 0.5
    s1 = (ts1 - 1) * 0.5
    s2 = (ts2 - 1) * 0.5
    if ts0 == ts1 == ts2:
        ks = (k + 1.0) * s0                             # isotropic: scalar scale
    else:
        axis = jax.lax.broadcasted_iota(jnp.int32, k.shape, 1)
        scale = jnp.where(axis == 0, s0, jnp.where(axis == 1, s1, s2))
        ks = (k + 1.0) * scale

    # Truncating cast == floor (ks >= 0 after the clamp); reuse it for frac.
    fl_i = ks.astype(jnp.int32)                         # (BH, 3, N)
    frac = ks - fl_i.astype(jnp.float32)                # (BH, 3, N)

    fx = frac[:, 0:1, :]                                # (BH, 1, N)
    fy = frac[:, 1:2, :]
    fz = frac[:, 2:3, :]
    ix = fl_i[:, 0:1, :]
    iy = fl_i[:, 1:2, :]
    iz = fl_i[:, 2:3, :]

    # Vertex id along the sublane axis: v = 4*dx + 2*dy + dz.  These (and the
    # derived `off`) are data-independent; Mosaic constant-folds them.
    v = jax.lax.broadcasted_iota(jnp.int32, out_shape, 1)
    dx = (v >> 2) & 1
    dy = (v >> 1) & 1
    dz = v & 1

    # Trilinear weights: full (BH, 8, N) vreg tiles, single unmasked store.
    wx = jnp.where(dx == 1, fx, 1.0 - fx)
    wy = jnp.where(dy == 1, fy, 1.0 - fy)
    wz = jnp.where(dz == 1, fz, 1.0 - fz)
    lc_ref[...] = wx * wy * wz

    # Flattened cell-vertex index: hoisted base + constant per-vertex offset.
    base = ix * (ts1 * ts2) + iy * ts2 + iz             # (BH, 1, N)
    off = dx * (ts1 * ts2) + dy * ts2 + dz              # (BH, 8, N), constant
    fi_ref[...] = base + off


# ----------------------------------------------------------------------------
# Wrapper (glue reshapes / padding in plain JAX; hot path is in the kernel).
# ----------------------------------------------------------------------------
def differentiable_positions(keys, *, tensor_size=20, heads=4, dim=3,
                             eps=1e-7):
    """keys: float32 [B, heads*dim, N] -> (local_coordinate, flattened_index)."""
    assert dim == 3, "only dim=3 (trilinear) implemented"
    B, C, N = keys.shape
    assert C == heads * dim
    if isinstance(tensor_size, int):
        ts = (tensor_size,) * dim
    else:
        ts = tuple(tensor_size)
        assert len(ts) == dim
    spread = 8  # num_cell_vertices for dim == 3

    bh = B * heads
    keys_r = keys.reshape(bh, dim, N)

    # Lane-dense tiling: pad N only to a multiple of 128 so stores are
    # unmasked full-width vst; ragged last blocks handled by cdiv grids.
    n_pad = _round_up(N, 128)
    if n_pad != N:
        keys_r = jnp.pad(keys_r, ((0, 0), (0, 0), (0, n_pad - N)))

    dual_tc, points_budget, vmem_cap = _tpu_budget()

    # Pick the largest (bh_tile, n_tile) within the per-step point budget.
    n_tile = min(n_pad, max(128, (points_budget // 128) * 128))
    bh_tile = min(bh, max(1, points_budget // n_tile))
    grid_bh = pl.cdiv(bh, bh_tile)
    grid_n = pl.cdiv(n_pad, n_tile)

    # Dual-TensorCore parts (v7x): ensure >= 2 parallel steps so both TCs get
    # work, preferring an even split along the points axis.  Single-TC parts
    # (v5e/v6e) keep the largest tile.
    if dual_tc and grid_bh * grid_n < 2:
        if n_tile >= 256:
            n_tile = _round_up(n_tile // 2, 128)
            grid_n = pl.cdiv(n_pad, n_tile)
        elif bh_tile >= 2:
            bh_tile = (bh_tile + 1) // 2
            grid_bh = pl.cdiv(bh, bh_tile)
    grid = (grid_bh, grid_n)

    # Scoped VMEM default is only 16 MiB (v5e) / 32 MiB (v6e/v7x); raise it
    # just enough for the double-buffered tiles, bounded per generation.
    step_bytes = bh_tile * n_tile * (dim + 2 * spread) * 4   # ~76 B/point
    vmem_limit = int(min(vmem_cap, max(32 << 20, 2 * step_bytes + (8 << 20))))

    kernel = functools.partial(_diff_positions_kernel, ts=ts, eps=eps)

    lc, fi = pl.pallas_call(
        kernel,
        out_shape=(
            jax.ShapeDtypeStruct((bh, spread, n_pad), jnp.float32),
            jax.ShapeDtypeStruct((bh, spread, n_pad), jnp.int32),
        ),
        grid=grid,
        in_specs=[pl.BlockSpec((bh_tile, dim, n_tile), lambda i, j: (i, 0, j))],
        out_specs=(
            pl.BlockSpec((bh_tile, spread, n_tile), lambda i, j: (i, 0, j)),
            pl.BlockSpec((bh_tile, spread, n_tile), lambda i, j: (i, 0, j)),
        ),
        compiler_params=pltpu.CompilerParams(
            dimension_semantics=("parallel", "parallel"),
            vmem_limit_bytes=vmem_limit),
    )(keys_r)

    if n_pad != N:
        lc = lc[:, :, :N]
        fi = fi[:, :, :N]

    local_coordinate = lc.reshape(B, heads, spread, N)
    flattened_index = fi.reshape(B, heads, spread, N)
    return local_coordinate, flattened_index


# ----------------------------------------------------------------------------
# Pure-JAX reference (mirrors the PyTorch semantics) for verification.
# ----------------------------------------------------------------------------
def _reference(keys, *, tensor_size=20, heads=4, dim=3, eps=1e-7):
    B, C, N = keys.shape
    ts = (tensor_size,) * dim if isinstance(tensor_size, int) else tuple(tensor_size)
    tsf = np.asarray(ts, dtype=np.float32)
    k = keys.reshape(B * heads, dim, N)
    k = jnp.clip(k, -1.0 + eps, 1.0 - eps)
    ks = (k + 1.0) * ((tsf.reshape(1, dim, 1) - 1.0) * 0.5)
    fl = jnp.floor(ks)
    frac = ks - fl
    fli = fl.astype(jnp.int32)
    ws, fis = [], []
    for dx in (0, 1):
        for dy in (0, 1):
            for dz in (0, 1):
                wx = frac[:, 0] if dx else 1.0 - frac[:, 0]
                wy = frac[:, 1] if dy else 1.0 - frac[:, 1]
                wz = frac[:, 2] if dz else 1.0 - frac[:, 2]
                ws.append(wx * wy * wz)
                idx = ((fli[:, 0] + dx) * ts[1] * ts[2]
                       + (fli[:, 1] + dy) * ts[2]
                       + (fli[:, 2] + dz))
                fis.append(idx)
    lc = jnp.stack(ws, axis=1).reshape(B, heads, 8, N)
    fi = jnp.stack(fis, axis=1).reshape(B, heads, 8, N)
    return lc, fi


if __name__ == "__main__":
    # Small shapes consistent with the module: batch=2, heads=4, dim=3,
    # num_points=256, tensor_size=20.  Input channels = heads*dim = 12.
    B, HEADS, DIM, N = 2, 4, 3, 256
    TENSOR_SIZE = 20

    key = jax.random.PRNGKey(0)
    # slightly outside [-1, 1] to exercise the clamp
    keys = jax.random.uniform(key, (B, HEADS * DIM, N),
                              dtype=jnp.float32, minval=-1.2, maxval=1.2)

    lc, fi = differentiable_positions(
        keys, tensor_size=TENSOR_SIZE, heads=HEADS, dim=DIM)
    jax.block_until_ready((lc, fi))

    lc_ref, fi_ref = _reference(
        keys, tensor_size=TENSOR_SIZE, heads=HEADS, dim=DIM)

    assert lc.shape == (B, HEADS, 8, N) and lc.dtype == jnp.float32
    assert fi.shape == (B, HEADS, 8, N) and fi.dtype == jnp.int32
    np.testing.assert_allclose(np.asarray(lc), np.asarray(lc_ref),
                               rtol=1e-5, atol=1e-5)
    np.testing.assert_array_equal(np.asarray(fi), np.asarray(fi_ref))
    # index range check (mirrors the module's asserts)
    assert int(np.asarray(fi).min()) >= 0
    assert int(np.asarray(fi).max()) < TENSOR_SIZE ** 3

    print("KERNEL_OK")
</pallas_src>

<mosaic_0001>
module attributes {stable_mosaic.version = 11 : i64} {
  func.func @_diff_positions_kernel(%arg0: i32, %arg1: i32, %arg2: memref<8x3x256xf32, #tpu.memory_space<vmem>>, %arg3: memref<8x8x256xf32, #tpu.memory_space<vmem>>, %arg4: memref<8x8x256xi32, #tpu.memory_space<vmem>>) attributes {dimension_semantics = [#tpu.dimension_semantics<parallel>, #tpu.dimension_semantics<parallel>], iteration_bounds = array<i64: 1, 1>, scalar_prefetch = 0 : i64, scratch_operands = 0 : i64, tpu.core_type = #tpu.core_type<tc>, window_params = [{transform_indices = @transform_0, window_bounds = array<i64: 8, 3, 256>}, {transform_indices = @transform_1, window_bounds = array<i64: 8, 8, 256>}, {transform_indices = @transform_2, window_bounds = array<i64: 8, 8, 256>}]} {
    %c0 = arith.constant 0 : index
    %c0_0 = arith.constant 0 : index
    %c0_1 = arith.constant 0 : index
    %0 = vector.load %arg2[%c0, %c0_0, %c0_1] : memref<8x3x256xf32, #tpu.memory_space<vmem>>, vector<8x3x256xf32>
    %cst = arith.constant -0.99999988 : f32
    %cst_2 = arith.constant 0.99999988 : f32
    %1 = vector.broadcast %cst : f32 to vector<8x3x256xf32>
    %2 = arith.maximumf %1, %0 : vector<8x3x256xf32>
    %3 = vector.broadcast %cst_2 : f32 to vector<8x3x256xf32>
    %4 = arith.minimumf %3, %2 : vector<8x3x256xf32>
    %cst_3 = arith.constant 1.000000e+00 : f32
    %5 = vector.broadcast %cst_3 : f32 to vector<8x3x256xf32>
    %6 = arith.addf %4, %5 : vector<8x3x256xf32>
    %cst_4 = arith.constant 9.500000e+00 : f32
    %7 = vector.broadcast %cst_4 : f32 to vector<8x3x256xf32>
    %8 = arith.mulf %6, %7 : vector<8x3x256xf32>
    %9 = arith.fptosi %8 : vector<8x3x256xf32> to vector<8x3x256xi32>
    %10 = arith.sitofp %9 : vector<8x3x256xi32> to vector<8x3x256xf32>
    %11 = arith.subf %8, %10 : vector<8x3x256xf32>
    %12 = vector.extract_strided_slice %11 {offsets = [0, 0, 0], sizes = [8, 1, 256], strides = [1, 1, 1]} : vector<8x3x256xf32> to vector<8x1x256xf32>
    %13 = vector.extract_strided_slice %11 {offsets = [0, 1, 0], sizes = [8, 1, 256], strides = [1, 1, 1]} : vector<8x3x256xf32> to vector<8x1x256xf32>
    %14 = vector.extract_strided_slice %11 {offsets = [0, 2, 0], sizes = [8, 1, 256], strides = [1, 1, 1]} : vector<8x3x256xf32> to vector<8x1x256xf32>
    %15 = vector.extract_strided_slice %9 {offsets = [0, 0, 0], sizes = [8, 1, 256], strides = [1, 1, 1]} : vector<8x3x256xi32> to vector<8x1x256xi32>
    %16 = vector.extract_strided_slice %9 {offsets = [0, 1, 0], sizes = [8, 1, 256], strides = [1, 1, 1]} : vector<8x3x256xi32> to vector<8x1x256xi32>
    %17 = vector.extract_strided_slice %9 {offsets = [0, 2, 0], sizes = [8, 1, 256], strides = [1, 1, 1]} : vector<8x3x256xi32> to vector<8x1x256xi32>
    %18 = tpu.iota {dimensions = array<i32: 1>} : vector<8x8x256xi32>
    %c2_i32 = arith.constant 2 : i32
    %19 = vector.broadcast %c2_i32 : i32 to vector<8x8x256xi32>
    %20 = arith.shrsi %18, %19 : vector<8x8x256xi32>
    %c1_i32 = arith.constant 1 : i32
    %21 = vector.broadcast %c1_i32 : i32 to vector<8x8x256xi32>
    %22 = arith.andi %20, %21 : vector<8x8x256xi32>
    %c1_i32_5 = arith.constant 1 : i32
    %23 = vector.broadcast %c1_i32_5 : i32 to vector<8x8x256xi32>
    %24 = arith.shrsi %18, %23 : vector<8x8x256xi32>
    %c1_i32_6 = arith.constant 1 : i32
    %25 = vector.broadcast %c1_i32_6 : i32 to vector<8x8x256xi32>
    %26 = arith.andi %24, %25 : vector<8x8x256xi32>
    %c1_i32_7 = arith.constant 1 : i32
    %27 = vector.broadcast %c1_i32_7 : i32 to vector<8x8x256xi32>
    %28 = arith.andi %18, %27 : vector<8x8x256xi32>
    %c1_i32_8 = arith.constant 1 : i32
    %29 = vector.broadcast %c1_i32_8 : i32 to vector<8x8x256xi32>
    %30 = arith.cmpi eq, %22, %29 : vector<8x8x256xi32>
    %cst_9 = arith.constant 1.000000e+00 : f32
    %31 = vector.broadcast %cst_9 : f32 to vector<8x1x256xf32>
    %32 = arith.subf %31, %12 : vector<8x1x256xf32>
    %33 = vector.shape_cast %12 : vector<8x1x256xf32> to vector<8x1x256xf32>
    %34 = vector.broadcast %33 : vector<8x1x256xf32> to vector<8x8x256xf32>
    %35 = vector.shape_cast %32 : vector<8x1x256xf32> to vector<8x1x256xf32>
    %36 = vector.broadcast %35 : vector<8x1x256xf32> to vector<8x8x256xf32>
    %37 = arith.select %30, %34, %36 : vector<8x8x256xi1>, vector<8x8x256xf32>
    %c1_i32_10 = arith.constant 1 : i32
    %38 = vector.broadcast %c1_i32_10 : i32 to vector<8x8x256xi32>
    %39 = arith.cmpi eq, %26, %38 : vector<8x8x256xi32>
    %cst_11 = arith.constant 1.000000e+00 : f32
    %40 = vector.broadcast %cst_11 : f32 to vector<8x1x256xf32>
    %41 = arith.subf %40, %13 : vector<8x1x256xf32>
    %42 = vector.shape_cast %13 : vector<8x1x256xf32> to vector<8x1x256xf32>
    %43 = vector.broadcast %42 : vector<8x1x256xf32> to vector<8x8x256xf32>
    %44 = vector.shape_cast %41 : vector<8x1x256xf32> to vector<8x1x256xf32>
    %45 = vector.broadcast %44 : vector<8x1x256xf32> to vector<8x8x256xf32>
    %46 = arith.select %39, %43, %45 : vector<8x8x256xi1>, vector<8x8x256xf32>
    %c1_i32_12 = arith.constant 1 : i32
    %47 = vector.broadcast %c1_i32_12 : i32 to vector<8x8x256xi32>
    %48 = arith.cmpi eq, %28, %47 : vector<8x8x256xi32>
    %cst_13 = arith.constant 1.000000e+00 : f32
    %49 = vector.broadcast %cst_13 : f32 to vector<8x1x256xf32>
    %50 = arith.subf %49, %14 : vector<8x1x256xf32>
    %51 = vector.shape_cast %14 : vector<8x1x256xf32> to vector<8x1x256xf32>
    %52 = vector.broadcast %51 : vector<8x1x256xf32> to vector<8x8x256xf32>
    %53 = vector.shape_cast %50 : vector<8x1x256xf32> to vector<8x1x256xf32>
    %54 = vector.broadcast %53 : vector<8x1x256xf32> to vector<8x8x256xf32>
    %55 = arith.select %48, %52, %54 : vector<8x8x256xi1>, vector<8x8x256xf32>
    %56 = arith.mulf %37, %46 : vector<8x8x256xf32>
    %57 = arith.mulf %56, %55 : vector<8x8x256xf32>
    %c0_14 = arith.constant 0 : index
    %c0_15 = arith.constant 0 : index
    %c0_16 = arith.constant 0 : index
    %58 = vector.load %arg3[%c0_14, %c0_15, %c0_16] : memref<8x8x256xf32, #tpu.memory_space<vmem>>, vector<8x8x256xf32>
    tpu.vector_store %arg3[%c0_14, %c0_15, %c0_16], %57 {strides = array<i32>} : memref<8x8x256xf32, #tpu.memory_space<vmem>>, vector<8x8x256xf32>,
    %c400_i32 = arith.constant 400 : i32
    %59 = vector.broadcast %c400_i32 : i32 to vector<8x1x256xi32>
    %60 = arith.muli %15, %59 : vector<8x1x256xi32>
    %c20_i32 = arith.constant 20 : i32
    %61 = vector.broadcast %c20_i32 : i32 to vector<8x1x256xi32>
    %62 = arith.muli %16, %61 : vector<8x1x256xi32>
    %63 = arith.addi %60, %62 : vector<8x1x256xi32>
    %64 = arith.addi %63, %17 : vector<8x1x256xi32>
    %c400_i32_17 = arith.constant 400 : i32
    %65 = vector.broadcast %c400_i32_17 : i32 to vector<8x8x256xi32>
    %66 = arith.muli %22, %65 : vector<8x8x256xi32>
    %c20_i32_18 = arith.constant 20 : i32
    %67 = vector.broadcast %c20_i32_18 : i32 to vector<8x8x256xi32>
    %68 = arith.muli %26, %67 : vector<8x8x256xi32>
    %69 = arith.addi %66, %68 : vector<8x8x256xi32>
    %70 = arith.addi %69, %28 : vector<8x8x256xi32>
    %71 = vector.broadcast %64 : vector<8x1x256xi32> to vector<8x8x256xi32>
    %72 = arith.addi %71, %70 : vector<8x8x256xi32>
    %c0_19 = arith.constant 0 : index
    %c0_20 = arith.constant 0 : index
    %c0_21 = arith.constant 0 : index
    %73 = vector.load %arg4[%c0_19, %c0_20, %c0_21] : memref<8x8x256xi32, #tpu.memory_space<vmem>>, vector<8x8x256xi32>
    tpu.vector_store %arg4[%c0_19, %c0_20, %c0_21], %72 {strides = array<i32>} : memref<8x8x256xi32, #tpu.memory_space<vmem>>, vector<8x8x256xi32>,
    return
  }
  func.func @transform_0(%arg0: i32, %arg1: i32) -> (i32, i32, i32) {
    %c0_i32 = arith.constant 0 : i32
    %c0_i32_0 = arith.constant 0 : i32
    return %arg0, %c0_i32, %arg1 : i32, i32, i32
  }
  func.func @transform_1(%arg0: i32, %arg1: i32) -> (i32, i32, i32) {
    %c0_i32 = arith.constant 0 : i32
    %c0_i32_0 = arith.constant 0 : i32
    return %arg0, %c0_i32, %arg1 : i32, i32, i32
  }
  func.func @transform_2(%arg0: i32, %arg1: i32) -> (i32, i32, i32) {
    %c0_i32 = arith.constant 0 : i32
    %c0_i32_0 = arith.constant 0 : i32
    return %arg0, %c0_i32, %arg1 : i32, i32, i32
  }
}

</mosaic_0001>

<bundles_post_ra>
// kernel: tpu_custom_call.1
= control target key start
LH: loop header
LB: loop body
LE: loop exit
PB: predicated region body
PF: predicated region fallthrough
CT: control target
= control target key end

     0   :  { %8 = vsyncpa [#allocation3], 0  ;;  %v76_v1 = vlaneseq  ;;  %s1953_s0 = inlined_call_operand.vmem [shape: f32[8,3,256], index: 0, kind: input, shape index: {}]   ;;  %s1954_s1 = inlined_call_operand.hbm [shape: f32[8,8,256], index: 1, kind: output, shape index: {0}]   ;;  %s1955_s2 = inlined_call_operand.hbm [shape: s32[8,8,256], index: 2, kind: output, shape index: {1}]  }
   0x1   :  { %v12_v0 = vld [vmem:[%s1953_s0] sm:$0x77]  ;;  %v13_v2 = vld [vmem:[%s1953_s0 + $0x8] sm:$0x77]  ;;  %v14_v3 = vld [vmem:[%s1953_s0 + $0x10] sm:$0x77] }
   0x2   :  { %v1330_v4 = vclamps-f32 %v12_v0, 0.9999999  ;;  %v1331_v5 = vclamps-f32 %v13_v2, 0.9999999  ;;  %v1332_v6 = vclamps-f32 %v14_v3, 0.9999999 }
   0x3   :  { %v77_v7 = vshrl.u32 %v76_v1, 7  ;;  %v15_v8 = vld [vmem:[%s1953_s0 + $0x18] sm:$0x77]  ;;  %v16_v18 = vld [vmem:[%s1953_s0 + $0x20] sm:$0x77] }
   0x4   :  { %v36_v9 = vadd.f32 1.0, %v1330_v4  ;;  %v37_v10 = vadd.f32 1.0, %v1331_v5  ;;  %v38_v11 = vadd.f32 1.0, %v1332_v6  ;;  %v1333_v17 = vclamps-f32 %v15_v8, 0.9999999 }
   0x5   :  { %v78_v12 = vshra.s32 %v77_v7, 2  ;;  %v80_v13 = vshra.s32 %v77_v7, 1  ;;  %v82_v15 = vand.u32 1, %v77_v7  ;;  %v1453_v16 = vsub.s32 0, %v77_v7  ;;  %v17_v23 = vld [vmem:[%s1953_s0 + $0x28] sm:$0x77] }
   0x6   :  { %v44_v14 = vmul.f32 9.5, %v36_v9  ;;  %v1462_v21 = vsub.s32 4, %v77_v7  ;;  %v1464_v22 = vsub.s32 1, %v77_v7  ;;  %v1469_v25 = vsub.s32 2, %v77_v7  ;;  %v18_v28 = vld [vmem:[%s1953_s0 + $0x30] sm:$0x77] }
   0x7   :  { %v1458_v19 = vand.u32 1, %v78_v12  ;;  %v1460_v20 = vand.u32 1, %v80_v13  ;;  %v45_v26 = vmul.f32 9.5, %v37_v10  ;;  %v1471_v27 = vmul.f32 9.5, %v38_v11 }
   0x8   :  { %v1354_v24 = vtrunc.f32 %v44_v14  ;;  %v1478_v31 = vsub.s32 5, %v77_v7  ;;  %v1480_v32 = vsub.s32 6, %v77_v7 }
   0x9   :  { %v1134_v29 = vmul.u32 400, %v1458_v19  ;;  %v1135_v30 = vmul.u32 20, %v1460_v20 }
   0xa   :  { %9 = vsyncpa [#allocation5], 0  ;;  %v1482_v33 = vcvt.f32.s32 %v1354_v24  ;;  %v1356_v34 = vtrunc.f32 %v45_v26  ;;  %v1358_v35 = vtrunc.f32 %v1471_v27  ;;  %v39_v36 = vadd.f32 1.0, %v1333_v17  ;;  %v1501_v46 = vld [vmem:[%s1953_s0 + $0x38] sm:$0x77]  ;;  %s1422_s0 = smov [#allocation2]  }
   0xb   :  { %vm83_vm0 = vcmp.eq.s32.totalorder %v1458_v19, 1  ;;  %vm412_vm1 = vcmp.eq.s32.totalorder %v1460_v20, 1  ;;  %v1136_v37 = vadd.s32 %v1135_v30, %v1134_v29  ;;  %v1334_v38 = vclamps-f32 %v16_v18, 0.9999999  ;;  %s1303_s25 = sshll.u32 %s1422_s0, 4  ;;  %s1855_s25 = int_to_ptr.vmem [resolvable:$true] %s1303_s25 }
   0xc   :  { %v1335_v39 = vclamps-f32 %v17_v23, 0.9999999  ;;  %v1336_v40 = vclamps-f32 %v18_v28, 0.9999999  ;;  %v60_v41 = vcvt.s32.f32 %v1482_v33  ;;  %vm1488_vm2 = vcmp.eq.s32.totalorder %v82_v15, 1  ;;  %s1374_s26 = scalar_lea.vmem %s1855_s25, 2048  ;;  %p1379_p1 = scmp.lt.s32.totalorder %s1855_s25, %s1855_s25 }
   0xd   :  { %v1492_v43 = vcvt.f32.s32 %v1356_v34  ;;  %v1494_v44 = vcvt.f32.s32 %v1358_v35  ;;  %v1496_v45 = vmul.f32 9.5, %v39_v36  ;;  %v1503_v47 = vadd.s32 %v1136_v37, %v82_v15  ;;  %p1375_p0 = scmp.ne.s32.totalorder %s1855_s25, %s1374_s26  ;;  %p1380_p2 = scmp.lt.s32.totalorder %s1374_s26, %s1374_s26 }
   0xe   :  { %v40_v48 = vadd.f32 1.0, %v1334_v38  ;;  %v41_v49 = vadd.f32 1.0, %v1335_v39  ;;  %v42_v50 = vadd.f32 1.0, %v1336_v40  ;;  %v68_v51 = vsub.f32 %v44_v14, %v60_v41 }
   0xf   :  { %v61_v52 = vcvt.s32.f32 %v1492_v43  ;;  %v62_v53 = vcvt.s32.f32 %v1494_v44  ;;  %v1360_v54 = vtrunc.f32 %v1496_v45  ;;  %v1337_v58 = vclamps-f32 %v1501_v46, 0.9999999  ;;  %p1381_p3 = por %p1380_p2, %p1379_p1 }
  0x10   :  { %v1508_v55 = vmul.f32 9.5, %v40_v48  ;;  %v1510_v56 = vmul.f32 9.5, %v41_v49  ;;  %v1512_v57 = vmul.f32 9.5, %v42_v50  ;;  %v84_v59 = vsub.f32 1.0, %v68_v51 }
  0x11   :  { %v103_v60 = vrot.slane %v68_v51, %v1453_v16  ;;  %v416_v61 = vrot.slane %v68_v51, %v1464_v22  ;;  %v721_v62 = vrot.slane %v68_v51, %v1469_v25  ;;  %v107_v63 = vrot.slane %v68_v51, %v1462_v21  ;;  %p1382_p4 = pnand %p1381_p3, %p1375_p0 }
  0x12   :  { %v420_v0 = vrot.slane %v68_v51, %v1478_v31  ;;  %v725_v1 = vrot.slane %v68_v51, %v1480_v32  ;;  %v69_v2 = vsub.f32 %v45_v26, %v61_v52  ;;  %v255_v4 = vrot.slane %v84_v59, %v1453_v16 }
  0x13   :  { %v183_v3 = vrot.slane %v103_v60, %v1453_v16  ;;  %v496_v5 = vrot.slane %v416_v61, %v1464_v22  ;;  %v560_v6 = vrot.slane %v84_v59, %v1464_v22  ;;  %v801_v7 = vrot.slane %v721_v62, %v1469_v25 }
  0x14   :  { %v865_v8 = vrot.slane %v84_v59, %v1469_v25  ;;  %v187_v9 = vrot.slane %v107_v63, %v1453_v16  ;;  %v259_v10 = vrot.slane %v84_v59, %v1462_v21  ;;  %v335_v11 = vrot.slane %v255_v4, %v1453_v16 }
  0x15   :  { %v640_v12 = vrot.slane %v560_v6, %v1464_v22  ;;  %v500_v13 = vrot.slane %v420_v0, %v1464_v22  ;;  %v564_v14 = vrot.slane %v84_v59, %v1478_v31  ;;  %v805_v18 = vrot.slane %v725_v1, %v1469_v25 }
  0x16   :  { %v945_v15 = vrot.slane %v865_v8, %v1469_v25  ;;  %v339_v17 = vrot.slane %v259_v10, %v1453_v16  ;;  %v869_v23 = vrot.slane %v84_v59, %v1480_v32  ;;  %v396_v24 = vsel %vm83_vm0, %v183_v3, %v335_v11 }
  0x17   :  { %v701_v26 = vsel %vm412_vm1, %v496_v5, %v640_v12  ;;  %v644_v28 = vrot.slane %v564_v14, %v1464_v22  ;;  %v85_v29 = vsub.f32 1.0, %v69_v2  ;;  %v111_v38 = vrot.slane %v69_v2, %v1453_v16 }
  0x18   :  { %v1006_v30 = vsel %vm1488_vm2, %v801_v7, %v945_v15  ;;  %v1022_v34 = vmul.f32 %v701_v26, %v396_v24  ;;  %v397_v35 = vsel %vm83_vm0, %v187_v9, %v339_v17  ;;  %v949_v36 = vrot.slane %v869_v23, %v1469_v25 }
  0x19   :  { %v702_v37 = vsel %vm412_vm1, %v500_v13, %v644_v28  ;;  %v263_v39 = vrot.slane %v85_v29, %v1453_v16  ;;  %v424_v40 = vrot.slane %v69_v2, %v1464_v22  ;;  %v568_v50 = vrot.slane %v85_v29, %v1464_v22 }
  0x1a   :  { %v1038_v41 = vmul.f32 %v1022_v34, %v1006_v30  ;;  %v1007_v48 = vsel %vm1488_vm2, %v805_v18, %v949_v36  ;;  %v1023_v49 = vmul.f32 %v702_v37, %v397_v35  ;;  %v191_v51 = vrot.slane %v111_v38, %v1453_v16 }
  0x1b   :  { %v343_v52 = vrot.slane %v263_v39, %v1453_v16  ;;  %v504_v59 = vrot.slane %v424_v40, %v1464_v22  ;;  %v729_v60 = vrot.slane %v69_v2, %v1469_v25  ;;  %v648_v62 = vrot.slane %v568_v50, %v1464_v22 }
  0x1c   :  { %1054 = vst [vmem:[#allocation2] sm:$0xff] %v1038_v41  ;;  %v1039_v61 = vmul.f32 %v1023_v49, %v1007_v48  ;;  %v873_v63 = vrot.slane %v85_v29, %v1469_v25  ;;  %v115_v0 = vrot.slane %v69_v2, %v1462_v21  ;;  %v267_v4 = vrot.slane %v85_v29, %v1462_v21 }
  0x1d   :  { %v398_v1 = vsel %vm83_vm0, %v191_v51, %v343_v52  ;;  %v809_v3 = vrot.slane %v729_v60, %v1469_v25  ;;  %v428_v5 = vrot.slane %v69_v2, %v1478_v31  ;;  %v703_v6 = vsel %vm412_vm1, %v504_v59, %v648_v62 }
  0x1e   :  { %1055 = vst [vmem:[#allocation2 + $0x8] sm:$0xff] %v1039_v61  ;;  %v953_v7 = vrot.slane %v873_v63, %v1469_v25  ;;  %v195_v8 = vrot.slane %v115_v0, %v1453_v16  ;;  %v572_v9 = vrot.slane %v85_v29, %v1478_v31  ;;  %v1024_v10 = vmul.f32 %v703_v6, %v398_v1 }
  0x1f   :  { %v347_v11 = vrot.slane %v267_v4, %v1453_v16  ;;  %v508_v12 = vrot.slane %v428_v5, %v1464_v22  ;;  %v733_v13 = vrot.slane %v69_v2, %v1480_v32  ;;  %v877_v17 = vrot.slane %v85_v29, %v1480_v32 }
  0x20   :  { %v1008_v14 = vsel %vm1488_vm2, %v809_v3, %v953_v7  ;;  %v652_v15 = vrot.slane %v572_v9, %v1464_v22  ;;  %v70_v18 = vsub.f32 %v1471_v27, %v62_v53  ;;  %v1587_v2 = vcvt.f32.s32 %v1360_v54 }
  0x21   :  { %v1040_v23 = vmul.f32 %v1024_v10, %v1008_v14  ;;  %v399_v24 = vsel %vm83_vm0, %v195_v8, %v347_v11  ;;  %v813_v26 = vrot.slane %v733_v13, %v1469_v25  ;;  %v957_v30 = vrot.slane %v877_v17, %v1469_v25 }
  0x22   :  { %v704_v28 = vsel %vm412_vm1, %v508_v12, %v652_v15  ;;  %v86_v29 = vsub.f32 1.0, %v70_v18  ;;  %v119_v34 = vrot.slane %v70_v18, %v1453_v16  ;;  %v432_v53 = vrot.slane %v70_v18, %v1464_v22 }
  0x23   :  { %1056 = vst [vmem:[#allocation2 + $0x10] sm:$0xff] %v1040_v23  ;;  %v1025_v27 = vmul.f32 %v704_v28, %v399_v24  ;;  %v737_v35 = vrot.slane %v70_v18, %v1469_v25  ;;  %v123_v36 = vrot.slane %v70_v18, %v1462_v21  ;;  %v1009_v54 = vsel %vm1488_vm2, %v813_v26, %v957_v30 }
  0x24   :  { %v199_v37 = vrot.slane %v119_v34, %v1453_v16  ;;  %v271_v38 = vrot.slane %v86_v29, %v1453_v16  ;;  %v576_v39 = vrot.slane %v86_v29, %v1464_v22  ;;  %v512_v41 = vrot.slane %v432_v53, %v1464_v22 }
  0x25   :  { %v1041_v40 = vmul.f32 %v1025_v27, %v1009_v54  ;;  %v817_v48 = vrot.slane %v737_v35, %v1469_v25  ;;  %v881_v49 = vrot.slane %v86_v29, %v1469_v25  ;;  %v203_v52 = vrot.slane %v123_v36, %v1453_v16 }
  0x26   :  { %v351_v50 = vrot.slane %v271_v38, %v1453_v16  ;;  %v656_v51 = vrot.slane %v576_v39, %v1464_v22  ;;  %v275_v59 = vrot.slane %v86_v29, %v1462_v21  ;;  %v436_v61 = vrot.slane %v70_v18, %v1478_v31 }
  0x27   :  { %1057 = vst [vmem:[#allocation2 + $0x18] sm:$0xff] %v1041_v40  ;;  %v961_v60 = vrot.slane %v881_v49, %v1469_v25  ;;  %v580_v62 = vrot.slane %v86_v29, %v1478_v31  ;;  %v741_v63 = vrot.slane %v70_v18, %v1480_v32  ;;  %v885_v4 = vrot.slane %v86_v29, %v1480_v32 }
  0x28   :  { %v400_v0 = vsel %vm83_vm0, %v199_v37, %v351_v50  ;;  %v705_v1 = vsel %vm412_vm1, %v512_v41, %v656_v51  ;;  %v355_v3 = vrot.slane %v275_v59, %v1453_v16  ;;  %v516_v7 = vrot.slane %v436_v61, %v1464_v22 }
  0x29   :  { %v1010_v5 = vsel %vm1488_vm2, %v817_v48, %v961_v60  ;;  %v1026_v6 = vmul.f32 %v705_v1, %v400_v0  ;;  %v660_v8 = vrot.slane %v580_v62, %v1464_v22  ;;  %v821_v10 = vrot.slane %v741_v63, %v1469_v25 }
  0x2a   :  { %v401_v9 = vsel %vm83_vm0, %v203_v52, %v355_v3  ;;  %v965_v11 = vrot.slane %v885_v4, %v1469_v25  ;;  %v63_v12 = vcvt.s32.f32 %v1587_v2  ;;  %v1362_v15 = vtrunc.f32 %v1508_v55 }
  0x2b   :  { %v1042_v13 = vmul.f32 %v1026_v6, %v1010_v5  ;;  %v706_v14 = vsel %vm412_vm1, %v516_v7, %v660_v8  ;;  %v1364_v17 = vtrunc.f32 %v1510_v56  ;;  %v1366_v26 = vtrunc.f32 %v1512_v57 }
  0x2c   :  { %v1011_v18 = vsel %vm1488_vm2, %v821_v10, %v965_v11  ;;  %v1027_v23 = vmul.f32 %v706_v14, %v401_v9  ;;  %v71_v24 = vsub.f32 %v1496_v45, %v63_v12  ;;  %v1635_v28 = vcvt.f32.s32 %v1362_v15 }
  0x2d   :  { %1058 = vst [vmem:[#allocation2 + $0x20] sm:$0xff] %v1042_v13  ;;  %v1637_v30 = vcvt.f32.s32 %v1364_v17  ;;  %v43_v29 = vadd.f32 1.0, %v1337_v58  ;;  %v1070_v34 = vmul.u32 400, %v1482_v33  ;;  %v1679_v13 = vcvt.f32.s32 %v1366_v26 }
  0x2e   :  { %v1043_v27 = vmul.f32 %v1027_v23, %v1011_v18  ;;  %v87_v53 = vsub.f32 1.0, %v71_v24  ;;  %v127_v35 = vrot.slane %v71_v24, %v1453_v16  ;;  %v440_v36 = vrot.slane %v71_v24, %v1464_v22 }
  0x2f   :  { %v745_v45 = vrot.slane %v71_v24, %v1469_v25  ;;  %v131_v54 = vrot.slane %v71_v24, %v1462_v21  ;;  %v444_v37 = vrot.slane %v71_v24, %v1478_v31  ;;  %v749_v38 = vrot.slane %v71_v24, %v1480_v32 }
  0x30   :  { %1059 = vst [vmem:[#allocation2 + $0x28] sm:$0xff] %v1043_v27  ;;  %v207_v46 = vrot.slane %v127_v35, %v1453_v16  ;;  %v279_v58 = vrot.slane %v87_v53, %v1453_v16  ;;  %v520_v39 = vrot.slane %v440_v36, %v1464_v22  ;;  %v584_v40 = vrot.slane %v87_v53, %v1464_v22 }
  0x31   :  { %v825_v41 = vrot.slane %v745_v45, %v1469_v25  ;;  %v889_v48 = vrot.slane %v87_v53, %v1469_v25  ;;  %v211_v49 = vrot.slane %v131_v54, %v1453_v16  ;;  %v283_v50 = vrot.slane %v87_v53, %v1462_v21 }
  0x32   :  { %v359_v51 = vrot.slane %v279_v58, %v1453_v16  ;;  %v664_v52 = vrot.slane %v584_v40, %v1464_v22  ;;  %v524_v59 = vrot.slane %v444_v37, %v1464_v22  ;;  %v588_v60 = vrot.slane %v87_v53, %v1478_v31 }
  0x33   :  { %v969_v61 = vrot.slane %v889_v48, %v1469_v25  ;;  %v363_v62 = vrot.slane %v283_v50, %v1453_v16  ;;  %v829_v63 = vrot.slane %v749_v38, %v1469_v25  ;;  %v893_v0 = vrot.slane %v87_v53, %v1480_v32 }
  0x34   :  { %v402_v1 = vsel %vm83_vm0, %v207_v46, %v359_v51  ;;  %v707_v3 = vsel %vm412_vm1, %v520_v39, %v664_v52  ;;  %v668_v4 = vrot.slane %v588_v60, %v1464_v22  ;;  %v64_v5 = vcvt.s32.f32 %v1635_v28 }
  0x35   :  { %v1012_v6 = vsel %vm1488_vm2, %v825_v41, %v969_v61  ;;  %v1028_v7 = vmul.f32 %v707_v3, %v402_v1  ;;  %v403_v8 = vsel %vm83_vm0, %v211_v49, %v363_v62  ;;  %v973_v9 = vrot.slane %v893_v0, %v1469_v25 }
  0x36   :  { %v708_v10 = vsel %vm412_vm1, %v524_v59, %v668_v4  ;;  %v72_v11 = vsub.f32 %v1508_v55, %v64_v5  ;;  %v65_v12 = vcvt.s32.f32 %v1637_v30  ;;  %v1683_v18 = vmul.f32 9.5, %v43_v29 }
  0x37   :  { %v1044_v14 = vmul.f32 %v1028_v7, %v1012_v6  ;;  %v1013_v15 = vsel %vm1488_vm2, %v829_v63, %v973_v9  ;;  %v1029_v17 = vmul.f32 %v708_v10, %v403_v8  ;;  %v1080_v19 = vmul.u32 20, %v1494_v44 }
  0x38   :  { %v88_v23 = vsub.f32 1.0, %v72_v11  ;;  %v135_v24 = vrot.slane %v72_v11, %v1453_v16  ;;  %v448_v27 = vrot.slane %v72_v11, %v1464_v22  ;;  %v753_v53 = vrot.slane %v72_v11, %v1469_v25 }
  0x39   :  { %1060 = vst [vmem:[#allocation2 + $0x30] sm:$0xff] %v1044_v14  ;;  %v1045_v55 = vmul.f32 %v1029_v17, %v1013_v15  ;;  %v139_v35 = vrot.slane %v72_v11, %v1462_v21  ;;  %v452_v26 = vrot.slane %v72_v11, %v1478_v31  ;;  %v757_v36 = vrot.slane %v72_v11, %v1480_v32 }
  0x3a   :  { %v215_v45 = vrot.slane %v135_v24, %v1453_v16  ;;  %v287_v29 = vrot.slane %v88_v23, %v1453_v16  ;;  %v528_v54 = vrot.slane %v448_v27, %v1464_v22  ;;  %v592_v37 = vrot.slane %v88_v23, %v1464_v22 }
  0x3b   :  { %1061 = vst [vmem:[#allocation2 + $0x38] sm:$0xff] %v1045_v55  ;;  %v833_v38 = vrot.slane %v753_v53, %v1469_v25  ;;  %v897_v46 = vrot.slane %v88_v23, %v1469_v25  ;;  %v219_v58 = vrot.slane %v139_v35, %v1453_v16  ;;  %v291_v39 = vrot.slane %v88_v23, %v1462_v21 }
  0x3c   :  { %v367_v40 = vrot.slane %v287_v29, %v1453_v16  ;;  %v672_v41 = vrot.slane %v592_v37, %v1464_v22  ;;  %v532_v48 = vrot.slane %v452_v26, %v1464_v22  ;;  %v596_v49 = vrot.slane %v88_v23, %v1478_v31 }
  0x3d   :  { %v977_v50 = vrot.slane %v897_v46, %v1469_v25  ;;  %v371_v51 = vrot.slane %v291_v39, %v1453_v16  ;;  %v837_v52 = vrot.slane %v757_v36, %v1469_v25  ;;  %v901_v59 = vrot.slane %v88_v23, %v1480_v32 }
  0x3e   :  { %v404_v60 = vsel %vm83_vm0, %v215_v45, %v367_v40  ;;  %v709_v61 = vsel %vm412_vm1, %v528_v54, %v672_v41  ;;  %v676_v62 = vrot.slane %v596_v49, %v1464_v22  ;;  %v73_v63 = vsub.f32 %v1510_v56, %v65_v12 }
  0x3f   :  { %v1014_v0 = vsel %vm1488_vm2, %v833_v38, %v977_v50  ;;  %v1030_v1 = vmul.f32 %v709_v61, %v404_v60  ;;  %v405_v3 = vsel %vm83_vm0, %v219_v58, %v371_v51  ;;  %v981_v4 = vrot.slane %v901_v59, %v1469_v25 }
  0x40   :  { %v710_v5 = vsel %vm412_vm1, %v532_v48, %v676_v62  ;;  %v89_v6 = vsub.f32 1.0, %v73_v63  ;;  %v143_v7 = vrot.slane %v73_v63, %v1453_v16  ;;  %v456_v8 = vrot.slane %v73_v63, %v1464_v22 }
  0x41   :  { %v1046_v9 = vmul.f32 %v1030_v1, %v1014_v0  ;;  %v1015_v56 = vsel %vm1488_vm2, %v837_v52, %v981_v4  ;;  %v1031_v10 = vmul.f32 %v710_v5, %v405_v3  ;;  %v761_v11 = vrot.slane %v73_v63, %v1469_v25 }
  0x42   :  { %v223_v12 = vrot.slane %v143_v7, %v1453_v16  ;;  %v295_v14 = vrot.slane %v89_v6, %v1453_v16  ;;  %v536_v15 = vrot.slane %v456_v8, %v1464_v22  ;;  %v600_v17 = vrot.slane %v89_v6, %v1464_v22 }
  0x43   :  { %1062 = vst [vmem:[#allocation2 + $0x40] sm:$0xff] %v1046_v9  ;;  %v1047_v23 = vmul.f32 %v1031_v10, %v1015_v56  ;;  %v841_v24 = vrot.slane %v761_v11, %v1469_v25  ;;  %v905_v27 = vrot.slane %v89_v6, %v1469_v25  ;;  %v147_v53 = vrot.slane %v73_v63, %v1462_v21 }
  0x44   :  { %v375_v55 = vrot.slane %v295_v14, %v1453_v16  ;;  %v680_v35 = vrot.slane %v600_v17, %v1464_v22  ;;  %v299_v26 = vrot.slane %v89_v6, %v1462_v21  ;;  %v460_v36 = vrot.slane %v73_v63, %v1478_v31 }
  0x45   :  { %1063 = vst [vmem:[#allocation2 + $0x48] sm:$0xff] %v1047_v23  ;;  %v985_v45 = vrot.slane %v905_v27, %v1469_v25  ;;  %v227_v29 = vrot.slane %v147_v53, %v1453_v16  ;;  %v604_v54 = vrot.slane %v89_v6, %v1478_v31  ;;  %v765_v37 = vrot.slane %v73_v63, %v1480_v32 }
  0x46   :  { %v406_v38 = vsel %vm83_vm0, %v223_v12, %v375_v55  ;;  %v711_v46 = vsel %vm412_vm1, %v536_v15, %v680_v35  ;;  %v379_v58 = vrot.slane %v299_v26, %v1453_v16  ;;  %v540_v39 = vrot.slane %v460_v36, %v1464_v22 }
  0x47   :  { %v1016_v40 = vsel %vm1488_vm2, %v841_v24, %v985_v45  ;;  %v1032_v41 = vmul.f32 %v711_v46, %v406_v38  ;;  %v684_v48 = vrot.slane %v604_v54, %v1464_v22  ;;  %v845_v49 = vrot.slane %v765_v37, %v1469_v25 }
  0x48   :  { %v407_v50 = vsel %vm83_vm0, %v227_v29, %v379_v58  ;;  %v909_v51 = vrot.slane %v89_v6, %v1480_v32  ;;  %v66_v52 = vcvt.s32.f32 %v1679_v13  ;;  %v1368_v59 = vtrunc.f32 %v1683_v18 }
  0x49   :  { %v1048_v60 = vmul.f32 %v1032_v41, %v1016_v40  ;;  %v712_v61 = vsel %vm412_vm1, %v540_v39, %v684_v48  ;;  %v1078_v62 = vmul.u32 20, %v1482_v33  ;;  %v1346_v63 = vrot.slane %v1482_v33, 10 }
  0x4a   :  { %v989_v0 = vrot.slane %v909_v51, %v1469_v25  ;;  %v1033_v1 = vmul.f32 %v712_v61, %v407_v50  ;;  %v74_v3 = vsub.f32 %v1512_v57, %v66_v52  ;;  %v1761_v4 = vcvt.f32.s32 %v1368_v59 }
  0x4b   :  { %1064 = vst [vmem:[#allocation2 + $0x50] sm:$0xff] %v1048_v60  ;;  %v1338_v5 = vrot.slane %v1078_v62, 9  ;;  %v1071_v6 = vmul.u32 400, %v1492_v43  ;;  %v1079_v7 = vmul.u32 20, %v1492_v43  ;;  %v1347_v8 = vrot.slane %v1492_v43, 10 }
  0x4c   :  { %v1017_v9 = vsel %vm1488_vm2, %v845_v49, %v989_v0  ;;  %v90_v56 = vsub.f32 1.0, %v74_v3  ;;  %v151_v10 = vrot.slane %v74_v3, %v1453_v16  ;;  %v464_v11 = vrot.slane %v74_v3, %v1464_v22 }
  0x4d   :  { %v1049_v12 = vmul.f32 %v1033_v1, %v1017_v9  ;;  %v769_v57 = vrot.slane %v74_v3, %v1469_v25  ;;  %v155_v14 = vrot.slane %v74_v3, %v1462_v21  ;;  %v468_v15 = vrot.slane %v74_v3, %v1478_v31 }
  0x4e   :  { %v231_v17 = vrot.slane %v151_v10, %v1453_v16  ;;  %v303_v23 = vrot.slane %v90_v56, %v1453_v16  ;;  %v544_v24 = vrot.slane %v464_v11, %v1464_v22  ;;  %v608_v27 = vrot.slane %v90_v56, %v1464_v22 }
  0x4f   :  { %1065 = vst [vmem:[#allocation2 + $0x58] sm:$0xff] %v1049_v12  ;;  %v849_v53 = vrot.slane %v769_v57, %v1469_v25  ;;  %v913_v55 = vrot.slane %v90_v56, %v1469_v25  ;;  %v235_v35 = vrot.slane %v155_v14, %v1453_v16  ;;  %v307_v26 = vrot.slane %v90_v56, %v1462_v21 }
  0x50   :  { %v383_v36 = vrot.slane %v303_v23, %v1453_v16  ;;  %v688_v45 = vrot.slane %v608_v27, %v1464_v22  ;;  %v548_v29 = vrot.slane %v468_v15, %v1464_v22  ;;  %v612_v54 = vrot.slane %v90_v56, %v1478_v31 }
  0x51   :  { %v993_v37 = vrot.slane %v913_v55, %v1469_v25  ;;  %v387_v38 = vrot.slane %v307_v26, %v1453_v16  ;;  %v773_v46 = vrot.slane %v74_v3, %v1480_v32  ;;  %v917_v58 = vrot.slane %v90_v56, %v1480_v32 }
  0x52   :  { %v408_v39 = vsel %vm83_vm0, %v231_v17, %v383_v36  ;;  %v713_v40 = vsel %vm412_vm1, %v544_v24, %v688_v45  ;;  %v692_v41 = vrot.slane %v612_v54, %v1464_v22  ;;  %v67_v48 = vcvt.s32.f32 %v1761_v4 }
  0x53   :  { %v1018_v49 = vsel %vm1488_vm2, %v849_v53, %v993_v37  ;;  %v1034_v50 = vmul.f32 %v713_v40, %v408_v39  ;;  %v409_v51 = vsel %vm83_vm0, %v235_v35, %v387_v38  ;;  %v853_v52 = vrot.slane %v773_v46, %v1469_v25 }
  0x54   :  { %v714_v59 = vsel %vm412_vm1, %v548_v29, %v692_v41  ;;  %v997_v60 = vrot.slane %v917_v58, %v1469_v25  ;;  %v75_v61 = vsub.f32 %v1683_v18, %v67_v48  ;;  %v1102_v62 = vadd.s32 %v1338_v5, %v1070_v34 }
  0x55   :  { %v1050_v0 = vmul.f32 %v1034_v50, %v1018_v49  ;;  %v1035_v1 = vmul.f32 %v714_v59, %v409_v51  ;;  %v1339_v3 = vrot.slane %v1079_v7, 9  ;;  %v1072_v9 = vmul.u32 400, %v1494_v44 }
  0x56   :  { %v1019_v56 = vsel %vm1488_vm2, %v853_v52, %v997_v60  ;;  %v91_v10 = vsub.f32 1.0, %v75_v61  ;;  %v159_v11 = vrot.slane %v75_v61, %v1453_v16  ;;  %v472_v12 = vrot.slane %v75_v61, %v1464_v22 }
  0x57   :  { %1066 = vst [vmem:[#allocation2 + $0x60] sm:$0xff] %v1050_v0  ;;  %v1051_v57 = vmul.f32 %v1035_v1, %v1019_v56  ;;  %v777_v18 = vrot.slane %v75_v61, %v1469_v25  ;;  %v163_v14 = vrot.slane %v75_v61, %v1462_v21  ;;  %v476_v34 = vrot.slane %v75_v61, %v1478_v31 }
  0x58   :  { %v239_v5 = vrot.slane %v159_v11, %v1453_v16  ;;  %v311_v7 = vrot.slane %v91_v10, %v1453_v16  ;;  %v552_v15 = vrot.slane %v472_v12, %v1464_v22  ;;  %v616_v17 = vrot.slane %v91_v10, %v1464_v22 }
  0x59   :  { %1067 = vst [vmem:[#allocation2 + $0x68] sm:$0xff] %v1051_v57  ;;  %v857_v23 = vrot.slane %v777_v18, %v1469_v25  ;;  %v921_v24 = vrot.slane %v91_v10, %v1469_v25  ;;  %v243_v27 = vrot.slane %v163_v14, %v1453_v16  ;;  %v315_v53 = vrot.slane %v91_v10, %v1462_v21 }
  0x5a   :  { %v391_v55 = vrot.slane %v311_v7, %v1453_v16  ;;  %v696_v35 = vrot.slane %v616_v17, %v1464_v22  ;;  %v556_v26 = vrot.slane %v476_v34, %v1464_v22  ;;  %v620_v36 = vrot.slane %v91_v10, %v1478_v31 }
  0x5b   :  { %v1001_v45 = vrot.slane %v921_v24, %v1469_v25  ;;  %v395_v29 = vrot.slane %v315_v53, %v1453_v16  ;;  %v781_v54 = vrot.slane %v75_v61, %v1480_v32  ;;  %v925_v37 = vrot.slane %v91_v10, %v1480_v32 }
  0x5c   :  { %v410_v38 = vsel %vm83_vm0, %v239_v5, %v391_v55  ;;  %v715_v46 = vsel %vm412_vm1, %v552_v15, %v696_v35  ;;  %v700_v58 = vrot.slane %v620_v36, %v1464_v22  ;;  %v1126_v39 = vadd.s32 %v1346_v63, %v1102_v62 }
  0x5d   :  { %v1020_v31 = vsel %vm1488_vm2, %v857_v23, %v1001_v45  ;;  %v1036_v40 = vmul.f32 %v715_v46, %v410_v38  ;;  %v411_v41 = vsel %vm83_vm0, %v243_v27, %v395_v29  ;;  %v861_v32 = vrot.slane %v781_v54, %v1469_v25 }
  0x5e   :  { %v716_v48 = vsel %vm412_vm1, %v556_v26, %v700_v58  ;;  %v1005_v49 = vrot.slane %v925_v37, %v1469_v25  ;;  %v1141_v22 = vrot.slane %v1126_v39, %v1453_v16  ;;  %v1145_v33 = vrot.slane %v1126_v39, %v1462_v21 }
  0x5f   :  { %v1052_v63 = vmul.f32 %v1036_v40, %v1020_v31  ;;  %v1037_v50 = vmul.f32 %v716_v48, %v411_v41  ;;  %v1103_v51 = vadd.s32 %v1339_v3, %v1071_v6  ;;  %v1348_v25 = vrot.slane %v1494_v44, 10 }
  0x60   :  { %v1021_v52 = vsel %vm1488_vm2, %v861_v32, %v1005_v49  ;;  %v1205_v59 = vrot.slane %v1141_v22, %v1453_v16  ;;  %v1209_v20 = vrot.slane %v1145_v33, %v1453_v16  ;;  %v1340_v62 = vrot.slane %v1080_v19, 9 }
  0x61   :  { %1068 = vst [vmem:[#allocation2 + $0x70] sm:$0xff] %v1052_v63  ;;  %v1053_v60 = vmul.f32 %v1037_v50, %v1021_v52  ;;  %v1127_v61 = vadd.s32 %v1347_v8, %v1103_v51  ;;  %v1073_v6 = vmul.u32 400, %v1587_v2  ;;  %v1081_v1 = vmul.u32 20, %v1587_v2 }
  0x62   :  { %v1266_v42 = vadd.s32 %v1205_v59, %v1503_v47  ;;  %v1267_v0 = vadd.s32 %v1209_v20, %v1503_v47  ;;  %v1349_v44 = vrot.slane %v1587_v2, 10  ;;  %v1104_v8 = vadd.s32 %v1340_v62, %v1072_v9 }
  0x63   :  { %1069 = vst [vmem:[#allocation2 + $0x78] sm:$0xff] %v1053_v60  ;;  %v1149_v3 = vrot.slane %v1127_v61, %v1453_v16  ;;  %v1153_v43 = vrot.slane %v1127_v61, %v1462_v21  ;;  %v1074_v56 = vmul.u32 400, %v1635_v28  ;;  %v1341_v10 = vrot.slane %v1081_v1, 9 }
  0x64   :  { %1282 = vst [vmem:[#allocation4] sm:$0xff] %v1266_v42  ;;  %1283 = vst [vmem:[#allocation4 + $0x8] sm:$0xff] %v1267_v0  ;;  %v1082_v11 = vmul.u32 20, %v1635_v28  ;;  %v1350_v12 = vrot.slane %v1635_v28, 10  ;;  %v1075_v57 = vmul.u32 400, %v1637_v30 }
  0x65   :  { %1385 = shalt.err (!%p1382_p4)
}
  0x66   :  { %s1386_s29 = scalar_lea.hbm %s1954_s1, 2048 }
  0x67   :  { %p1387_p5 = scmp.ne.s32.totalorder %s1954_s1, %s1386_s29  ;;  %p1390_p6 = scmp.lt.u32.totalorder %s1386_s29, %s1954_s1 }
  0x69   :  { %p1392_p7 = pnand %p1390_p6, %p1387_p5 }
  0x6b   :  { %1395 = shalt.err (!%p1392_p7)
}
  0x6c   :  { %s1423_s6 = smov 256   ;;  %s1424_s7 = smov 16   ;;  %v1213_v2 = vrot.slane %v1149_v3, %v1453_v16  ;;  %v1217_v28 = vrot.slane %v1153_v43, %v1453_v16  ;;  %v1128_v9 = vadd.s32 %v1348_v25, %v1104_v8  ;;  %v1083_v18 = vmul.u32 20, %v1637_v30 }
  0x6d   :  { %1309 = dma.vmem_to_hbm [thread:$0]  %s1855_s25, 2048, %s1954_s1, [#allocation3], %s1423_s6, %s1423_s6, %s1424_s7   ;;  %v1105_v14 = vadd.s32 %v1341_v10, %v1073_v6  ;;  %v1342_v34 = vrot.slane %v1082_v11, 9  ;;  %v1351_v5 = vrot.slane %v1637_v30, 10  ;;  %v1076_v7 = vmul.u32 400, %v1679_v13 }
  0x6e   :  { %v1268_v15 = vadd.s32 %v1213_v2, %v1503_v47  ;;  %v1269_v17 = vadd.s32 %v1217_v28, %v1503_v47  ;;  %v1157_v23 = vrot.slane %v1128_v9, %v1453_v16  ;;  %v1161_v24 = vrot.slane %v1128_v9, %v1462_v21  ;;  %s1425_s1 = smov [#allocation4]  }
  0x6f   :  { %v1129_v27 = vadd.s32 %v1349_v44, %v1105_v14  ;;  %v1106_v53 = vadd.s32 %v1342_v34, %v1074_v56  ;;  %v1343_v55 = vrot.slane %v1083_v18, 9  ;;  %v1084_v35 = vmul.u32 20, %v1679_v13  ;;  %s1315_s10 = sshll.u32 %s1425_s1, 4  ;;  %s1316_s10 = int_to_ptr.vmem [resolvable:$true] %s1315_s10 }
  0x70   :  { %1284 = vst [vmem:[#allocation4 + $0x10] sm:$0xff] %v1268_v15  ;;  %1285 = vst [vmem:[#allocation4 + $0x18] sm:$0xff] %v1269_v17  ;;  %v1221_v26 = vrot.slane %v1157_v23, %v1453_v16  ;;  %v1225_v30 = vrot.slane %v1161_v24, %v1453_v16  ;;  %v1352_v36 = vrot.slane %v1679_v13, 10  ;;  %v1077_v45 = vmul.u32 400, %v1761_v4  ;;  %s1396_s11 = scalar_lea.vmem %s1316_s10, 2048  ;;  %p1401_p9 = scmp.lt.s32.totalorder %s1316_s10, %s1316_s10 }
  0x71   :  { %v1165_v29 = vrot.slane %v1129_v27, %v1453_v16  ;;  %v1169_v54 = vrot.slane %v1129_v27, %v1462_v21  ;;  %v1130_v37 = vadd.s32 %v1350_v12, %v1106_v53  ;;  %v1107_v38 = vadd.s32 %v1343_v55, %v1075_v57  ;;  %p1397_p8 = scmp.ne.s32.totalorder %s1316_s10, %s1396_s11  ;;  %p1402_p10 = scmp.lt.s32.totalorder %s1396_s11, %s1396_s11 }
  0x72   :  { %v1270_v46 = vadd.s32 %v1221_v26, %v1503_v47  ;;  %v1271_v58 = vadd.s32 %v1225_v30, %v1503_v47  ;;  %v1344_v39 = vrot.slane %v1084_v35, 9  ;;  %v1085_v31 = vmul.u32 20, %v1761_v4 }
  0x73   :  { %v1229_v40 = vrot.slane %v1165_v29, %v1453_v16  ;;  %v1233_v41 = vrot.slane %v1169_v54, %v1453_v16  ;;  %v1173_v13 = vrot.slane %v1130_v37, %v1453_v16  ;;  %v1177_v32 = vrot.slane %v1130_v37, %v1462_v21  ;;  %p1403_p11 = por %p1402_p10, %p1401_p9 }
  0x74   :  { %1286 = vst [vmem:[#allocation4 + $0x20] sm:$0xff] %v1270_v46  ;;  %1287 = vst [vmem:[#allocation4 + $0x28] sm:$0xff] %v1271_v58  ;;  %v1131_v48 = vadd.s32 %v1351_v5, %v1107_v38  ;;  %v1108_v49 = vadd.s32 %v1344_v39, %v1076_v7  ;;  %v1345_v22 = vrot.slane %v1085_v31, 9  ;;  %v1353_v33 = vrot.slane %v1761_v4, 10 }
  0x75   :  { %v1272_v63 = vadd.s32 %v1229_v40, %v1503_v47  ;;  %v1273_v50 = vadd.s32 %v1233_v41, %v1503_v47  ;;  %v1237_v51 = vrot.slane %v1173_v13, %v1453_v16  ;;  %v1241_v19 = vrot.slane %v1177_v32, %v1453_v16  ;;  %p1404_p12 = pnand %p1403_p11, %p1397_p8 }
  0x76   :  { %v1181_v52 = vrot.slane %v1131_v48, %v1453_v16  ;;  %v1185_v59 = vrot.slane %v1131_v48, %v1462_v21  ;;  %v1132_v20 = vadd.s32 %v1352_v36, %v1108_v49  ;;  %v1109_v25 = vadd.s32 %v1345_v22, %v1077_v45 }
  0x77   :  { %1288 = vst [vmem:[#allocation4 + $0x30] sm:$0xff] %v1272_v63  ;;  %1289 = vst [vmem:[#allocation4 + $0x38] sm:$0xff] %v1273_v50  ;;  %v1274_v60 = vadd.s32 %v1237_v51, %v1503_v47  ;;  %v1275_v4 = vadd.s32 %v1241_v19, %v1503_v47 }
  0x78   :  { %v1245_v61 = vrot.slane %v1181_v52, %v1453_v16  ;;  %v1249_v62 = vrot.slane %v1185_v59, %v1453_v16  ;;  %v1189_v6 = vrot.slane %v1132_v20, %v1453_v16  ;;  %v1193_v42 = vrot.slane %v1132_v20, %v1462_v21 }
  0x79   :  { %1290 = vst [vmem:[#allocation4 + $0x40] sm:$0xff] %v1274_v60  ;;  %1291 = vst [vmem:[#allocation4 + $0x48] sm:$0xff] %v1275_v4  ;;  %v1133_v0 = vadd.s32 %v1353_v33, %v1109_v25 }
  0x7a   :  { %v1276_v1 = vadd.s32 %v1245_v61, %v1503_v47  ;;  %v1277_v44 = vadd.s32 %v1249_v62, %v1503_v47  ;;  %v1253_v3 = vrot.slane %v1189_v6, %v1453_v16  ;;  %v1257_v43 = vrot.slane %v1193_v42, %v1453_v16 }
  0x7b   :  { %v1197_v8 = vrot.slane %v1133_v0, %v1453_v16  ;;  %v1201_v56 = vrot.slane %v1133_v0, %v1462_v21 }
  0x7c   :  { %1292 = vst [vmem:[#allocation4 + $0x50] sm:$0xff] %v1276_v1  ;;  %1293 = vst [vmem:[#allocation4 + $0x58] sm:$0xff] %v1277_v44  ;;  %v1278_v10 = vadd.s32 %v1253_v3, %v1503_v47  ;;  %v1279_v11 = vadd.s32 %v1257_v43, %v1503_v47 }
  0x7d   :  { %v1261_v12 = vrot.slane %v1197_v8, %v1453_v16  ;;  %v1265_v57 = vrot.slane %v1201_v56, %v1453_v16 }
  0x7e   :  { %1294 = vst [vmem:[#allocation4 + $0x60] sm:$0xff] %v1278_v10  ;;  %1295 = vst [vmem:[#allocation4 + $0x68] sm:$0xff] %v1279_v11 }
  0x7f   :  { %v1280_v2 = vadd.s32 %v1261_v12, %v1503_v47  ;;  %v1281_v28 = vadd.s32 %v1265_v57, %v1503_v47 }
  0x81   :  { %1296 = vst [vmem:[#allocation4 + $0x70] sm:$0xff] %v1280_v2  ;;  %1297 = vst [vmem:[#allocation4 + $0x78] sm:$0xff] %v1281_v28 }
  0x82   :  { %1407 = shalt.err (!%p1404_p12)
}
  0x83   :  { %s1408_s14 = scalar_lea.hbm %s1955_s2, 2048 }
  0x84   :  { %p1409_p13 = scmp.ne.s32.totalorder %s1955_s2, %s1408_s14  ;;  %p1412_p0 = scmp.lt.u32.totalorder %s1408_s14, %s1955_s2 }
  0x86   :  { %p1414_p1 = pnand %p1412_p0, %p1409_p13 }
  0x88   :  { %1417 = shalt.err (!%p1414_p1)
}
  0x89   :  { %1321 = dma.vmem_to_hbm [thread:$0]  %s1316_s10, 2048, %s1955_s2, [#allocation5], %s1423_s6, %s1423_s6, %s1424_s7  }
  0x8a   :  { %1418 = dma.done.wait [#allocation3], 2048  }
  0x8b   :  { %1419 = vsyncadd [#allocation3], 4294965248 }
  0x8c   :  { %1420 = dma.done.wait [#allocation5], 2048  }
  0x8d   :  { %1421 = vsyncadd [#allocation5], 4294965248 }
  0x8e   :  { %1328 = vsyncpa [#allocation3], 1 }
  0x8f   :  { %1329 = vsyncpa [#allocation5], 1 }

</bundles_post_ra>
